<compile_context>
chip_gen: v5e
topology: v5e:2x2
jax: 0.10.0
libtpu: 0.0.40
codegen_flags: <defaults>
</compile_context>

<pallas_src>
import functools

import jax
import jax.numpy as jnp
from jax.experimental import pallas as pl
from jax.experimental.pallas import tpu as pltpu


def _round_up(x, m):
    return (x + m - 1) // m * m


def _pad2d(x, rows, cols):
    return jnp.pad(x, ((0, rows - x.shape[0]), (0, cols - x.shape[1])))


# ---------------------------------------------------------------------------
# Kernel 1: feature transform  XW = X @ W   (output bf16 for the aggregation)
# ---------------------------------------------------------------------------
def _xw_kernel(x_ref, w_ref, o_ref):
    o_ref[...] = jnp.dot(
        x_ref[...], w_ref[...], preferred_element_type=jnp.float32
    ).astype(o_ref.dtype)


def feature_transform(x, w, *, tile_m):
    n_pad, f_in = x.shape
    f_out = w.shape[1]
    return pl.pallas_call(
        _xw_kernel,
        out_shape=jax.ShapeDtypeStruct((n_pad, f_out), jnp.bfloat16),
        grid=(n_pad // tile_m,),
        in_specs=[
            pl.BlockSpec((tile_m, f_in), lambda i: (i, 0)),   # X row tile
            pl.BlockSpec((f_in, f_out), lambda i: (0, 0)),    # W (resident)
        ],
        out_specs=pl.BlockSpec((tile_m, f_out), lambda i: (i, 0)),
        compiler_params=pltpu.CompilerParams(
            dimension_semantics=("parallel",)),
    )(x, w)


# ---------------------------------------------------------------------------
# Kernel 2: neighborhood aggregation  out = [ReLU](A_norm @ XW + b)
#   grid = (row tiles i  [parallel],  reduction tiles k  [arbitrary, last])
#   f32 accumulator in VMEM scratch; bias/ReLU/store only at k == last.
# ---------------------------------------------------------------------------
def _agg_kernel(a_ref, xw_ref, b_ref, o_ref, acc_ref, *, apply_relu):
    k = pl.program_id(1)

    @pl.when(k == 0)
    def _():
        acc_ref[...] = jnp.zeros_like(acc_ref)

    acc_ref[...] += jnp.dot(
        a_ref[...], xw_ref[...], preferred_element_type=jnp.float32
    )

    @pl.when(k == pl.num_programs(1) - 1)
    def _():
        h = acc_ref[...] + b_ref[...]
        if apply_relu:
            h = jnp.maximum(h, 0.0)
        o_ref[...] = h.astype(o_ref.dtype)


def aggregate(a_bf16, xw_bf16, b, *, tm, tk, apply_relu):
    n_pad = a_bf16.shape[0]
    f_out = xw_bf16.shape[1]
    kernel = functools.partial(_agg_kernel, apply_relu=apply_relu)
    return pl.pallas_call(
        kernel,
        out_shape=jax.ShapeDtypeStruct((n_pad, f_out), jnp.float32),
        grid=(n_pad // tm, n_pad // tk),
        in_specs=[
            pl.BlockSpec((tm, tk), lambda i, k: (i, k)),      # A tile
            pl.BlockSpec((tk, f_out), lambda i, k: (k, 0)),   # XW tile
            pl.BlockSpec((1, f_out), lambda i, k: (0, 0)),    # bias (epilogue)
        ],
        out_specs=pl.BlockSpec((tm, f_out), lambda i, k: (i, 0)),
        scratch_shapes=[pltpu.VMEM((tm, f_out), jnp.float32)],
        compiler_params=pltpu.CompilerParams(
            dimension_semantics=("parallel", "arbitrary"),
            vmem_limit_bytes=32 * 1024 * 1024,
        ),
    )(a_bf16, xw_bf16, b.reshape(1, f_out))


def gcn_layer(a_bf16, x, w, b, *, tm, tk, apply_relu):
    xw = feature_transform(x, w, tile_m=tm)                   # bf16, computed once
    return aggregate(a_bf16, xw, b, tm=tm, tk=tk, apply_relu=apply_relu)


# ---------------------------------------------------------------------------
# Glue: D^-1/2 (A + I_missing) D^-1/2 from edge_index (matches PyG gcn_norm:
# self loops are added only for nodes that do not already have one).
# ---------------------------------------------------------------------------
def build_norm_adj(edge_index, num_nodes):
    src = edge_index[0]
    dst = edge_index[1]
    a = jnp.zeros((num_nodes, num_nodes), jnp.float32)
    # message passing: edge (src -> dst) contributes x[src] to out[dst]
    a = a.at[dst, src].add(1.0)
    # add_remaining_self_loops: only where the diagonal is still zero
    idx = jnp.arange(num_nodes)
    diag = a[idx, idx]
    a = a.at[idx, idx].add(jnp.where(diag == 0.0, 1.0, 0.0))
    deg = jnp.sum(a, axis=1)
    d_inv_sqrt = jnp.where(deg > 0, jax.lax.rsqrt(deg), 0.0)
    return d_inv_sqrt[:, None] * a * d_inv_sqrt[None, :]


# ---------------------------------------------------------------------------
# Tile-size selection (128/256-aligned, VMEM-conservative across v5e/v6e/v7x)
# ---------------------------------------------------------------------------
def _choose_tiles(num_nodes):
    n_pad = _round_up(num_nodes, 128)
    if n_pad >= 512:
        tm, tk = 256, 512
        n_pad = _round_up(n_pad, tk)
    else:
        tk = n_pad
        tm = 256 if n_pad % 256 == 0 else 128
        tm = min(tm, n_pad)
    return n_pad, tm, tk


# ---------------------------------------------------------------------------
# RelNet forward (eval mode: dropout = identity)
# ---------------------------------------------------------------------------
def relnet_forward(params, x, edge_index, num_nodes):
    n, f_in = x.shape
    hid = params["w1"].shape[1]
    out_dim = params["w3"].shape[1]

    n_pad, tm, tk = _choose_tiles(num_nodes)
    f_in_p = _round_up(f_in, 128)
    hid_p = _round_up(hid, 128)
    out_p = _round_up(out_dim, 128)

    # Normalized adjacency: built once, padded, cast to bf16 (dominant HBM traffic).
    a_norm = build_norm_adj(edge_index, num_nodes)
    a_bf16 = _pad2d(a_norm, n_pad, n_pad).astype(jnp.bfloat16)

    # Zero-pad activations / params to lane-dense shapes.
    x_p = _pad2d(x.astype(jnp.float32), n_pad, f_in_p)
    w1 = _pad2d(params["w1"], f_in_p, hid_p)
    w2 = _pad2d(params["w2"], hid_p, hid_p)
    w3 = _pad2d(params["w3"], hid_p, out_p)
    b1 = jnp.pad(params["b1"], (0, hid_p - hid))
    b2 = jnp.pad(params["b2"], (0, hid_p - hid))
    b3 = jnp.pad(params["b3"], (0, out_p - out_dim))

    h = gcn_layer(a_bf16, x_p, w1, b1, tm=tm, tk=tk, apply_relu=True)
    # F.dropout(p=0.5, training=False) -> identity
    h = gcn_layer(a_bf16, h, w2, b2, tm=tm, tk=tk, apply_relu=True)
    # F.dropout(p=0.5, training=False) -> identity
    out = gcn_layer(a_bf16, h, w3, b3, tm=tm, tk=tk, apply_relu=False)

    return out[:n, :out_dim]


# ---------------------------------------------------------------------------
# Param init (Glorot, like torch_geometric GCNConv)
# ---------------------------------------------------------------------------
def glorot(key, shape):
    fan_in, fan_out = shape
    limit = jnp.sqrt(6.0 / (fan_in + fan_out))
    return jax.random.uniform(key, shape, jnp.float32, -limit, limit)


def init_params(key, input_dim, hidden_dim, output_dim):
    k1, k2, k3 = jax.random.split(key, 3)
    return {
        "w1": glorot(k1, (input_dim, hidden_dim)),
        "b1": jnp.zeros((hidden_dim,), jnp.float32),
        "w2": glorot(k2, (hidden_dim, hidden_dim)),
        "b2": jnp.zeros((hidden_dim,), jnp.float32),
        "w3": glorot(k3, (hidden_dim, output_dim)),
        "b3": jnp.zeros((output_dim,), jnp.float32),
    }


if __name__ == "__main__":
    # Small deterministic example: 8 nodes, 16 directed edges,
    # input_dim=16, hidden_dim=32, output_dim=8.
    num_nodes = 8
    num_edges = 16
    input_dim, hidden_dim, output_dim = 16, 32, 8

    key = jax.random.PRNGKey(0)
    k_x, k_e, k_p = jax.random.split(key, 3)

    x = jax.random.normal(k_x, (num_nodes, input_dim), jnp.float32)
    edge_index = jax.random.randint(k_e, (2, num_edges), 0, num_nodes, jnp.int32)

    params = init_params(k_p, input_dim, hidden_dim, output_dim)

    out = relnet_forward(params, x, edge_index, num_nodes)
    out = jax.block_until_ready(out)

    assert out.shape == (num_nodes, output_dim), out.shape
    assert bool(jnp.all(jnp.isfinite(out)))
    print("KERNEL_OK")
</pallas_src>

<mosaic_0001>
module attributes {stable_mosaic.version = 11 : i64} {
  func.func @_xw_kernel(%arg0: i32, %arg1: memref<128x128xf32, #tpu.memory_space<vmem>>, %arg2: memref<128x128xf32, #tpu.memory_space<vmem>>, %arg3: memref<128x128xbf16, #tpu.memory_space<vmem>>) attributes {dimension_semantics = [#tpu.dimension_semantics<parallel>], iteration_bounds = array<i64: 1>, scalar_prefetch = 0 : i64, scratch_operands = 0 : i64, tpu.core_type = #tpu.core_type<tc>, window_params = [{transform_indices = @transform_0, window_bounds = array<i64: 128, 128>}, {pipeline_mode = #tpu.pipeline_mode<synchronous>, transform_indices = @transform_1, window_bounds = array<i64: 128, 128>}, {transform_indices = @transform_2, window_bounds = array<i64: 128, 128>}]} {
    %c0 = arith.constant 0 : index
    %c0_0 = arith.constant 0 : index
    %0 = vector.load %arg1[%c0, %c0_0] : memref<128x128xf32, #tpu.memory_space<vmem>>, vector<128x128xf32>
    %c0_1 = arith.constant 0 : index
    %c0_2 = arith.constant 0 : index
    %1 = vector.load %arg2[%c0_1, %c0_2] : memref<128x128xf32, #tpu.memory_space<vmem>>, vector<128x128xf32>
    %cst = arith.constant dense<0.000000e+00> : vector<128x128xf32>
    %2 = tpu.matmul %0, %1, %cst {dimension_numbers = #tpu.dot_dimension_numbers<[1], [0], [0], [1], [0, 0, 1, 1], [], []>} : vector<128x128xf32>, vector<128x128xf32>, vector<128x128xf32> -> vector<128x128xf32>
    %3 = arith.truncf %2 : vector<128x128xf32> to vector<128x128xbf16>
    %c0_3 = arith.constant 0 : index
    %c0_4 = arith.constant 0 : index
    %4 = vector.load %arg3[%c0_3, %c0_4] : memref<128x128xbf16, #tpu.memory_space<vmem>>, vector<128x128xbf16>
    tpu.vector_store %arg3[%c0_3, %c0_4], %3 {strides = array<i32>} : memref<128x128xbf16, #tpu.memory_space<vmem>>, vector<128x128xbf16>,
    return
  }
  func.func @transform_0(%arg0: i32) -> (i32, i32) {
    %c0_i32 = arith.constant 0 : i32
    %c0_i32_0 = arith.constant 0 : i32
    return %arg0, %c0_i32 : i32, i32
  }
  func.func @transform_1(%arg0: i32) -> (i32, i32) {
    %c0_i32 = arith.constant 0 : i32
    %c0_i32_0 = arith.constant 0 : i32
    %c0_i32_1 = arith.constant 0 : i32
    return %c0_i32, %c0_i32_0 : i32, i32
  }
  func.func @transform_2(%arg0: i32) -> (i32, i32) {
    %c0_i32 = arith.constant 0 : i32
    %c0_i32_0 = arith.constant 0 : i32
    return %arg0, %c0_i32 : i32, i32
  }
}

</mosaic_0001>

<bundles_post_ra>
// kernel: tpu_custom_call.1
= control target key start
LH: loop header
LB: loop body
LE: loop exit
PB: predicated region body
PF: predicated region fallthrough
CT: control target
= control target key end

     0   :  { %7 = vsyncpa [#allocation3], 0  ;;  %s404_s0 = inlined_call_operand.hbm [shape: f32[128,128], index: 0, kind: input, shape index: {}]   ;;  %s405_s1 = inlined_call_operand.hbm [shape: f32[128,128], index: 1, kind: input, shape index: {}]   ;;  %s406_s2 = inlined_call_operand.hbm [shape: bf16[128,128], index: 2, kind: output, shape index: {}]  }
   0x1   :  { %8 = vsyncpa [#allocation6], 0 }
   0x2   :  { %9 = vsyncpa [#allocation4], 0  ;;  %s14_s11 = sshll.u32 %s404_s0, 4  ;;  %s373_s12 = smov [#allocation2]   ;;  %s15_s11 = int_to_ptr.hbm [resolvable:$true] %s14_s11 }
   0x3   :  { %s16_s13 = sshll.u32 %s373_s12, 4  ;;  %s27_s16 = sshll.u32 %s405_s1, 4  ;;  %s17_s13 = int_to_ptr.vmem [resolvable:$true] %s16_s13  ;;  %s28_s16 = int_to_ptr.hbm [resolvable:$true] %s27_s16 }
   0x4   :  { %s374_s17 = smov 128   ;;  %s375_s18 = smov 8  }
   0x5   :  { %22 = dma.hbm_to_vmem [thread:$0]  %s15_s11, 2048, %s17_s13, [#allocation3], %s374_s17, %s374_s17, %s375_s18  }
   0x6   :  { %s376_s19 = smov [#allocation5]  }
   0x7   :  { %s29_s20 = sshll.u32 %s376_s19, 4  ;;  %s30_s20 = int_to_ptr.vmem [resolvable:$true] %s29_s20 }
   0x8   :  { %35 = dma.hbm_to_vmem [thread:$0]  %s28_s16, 2048, %s30_s20, [#allocation6], %s374_s17, %s374_s17, %s375_s18  }
   0x9   :  { %367 = dma.done.wait [#allocation3], 2048  }
   0xa   :  { %368 = vsyncadd [#allocation3], 4294965248 }
   0xb   :  { %369 = dma.done.wait [#allocation6], 2048  }
   0xc   :  { %370 = vsyncadd [#allocation6], 4294965248  ;;  %v75_v0 = vld [vmem:[#allocation5 + $0x78] sm:$0xff]  ;;  %v74_v1 = vld [vmem:[#allocation5 + $0x70] sm:$0xff]  ;;  %s377_s0 = smov [#allocation7]   ;;  %s179_s23 = sshll.u32 %s406_s2, 4  ;;  %s180_s23 = int_to_ptr.hbm [resolvable:$true] %s179_s23 }
   0xd   :  { %76 = vmatpush.msra.mxu0 %v75_v0  ;;  %240 = vmatpush.msra.mxu1 %v75_v0  ;;  %v73_v2 = vld [vmem:[#allocation5 + $0x68] sm:$0xff]  ;;  %v72_v3 = vld [vmem:[#allocation5 + $0x60] sm:$0xff]  ;;  %v71_v4 = vld [vmem:[#allocation5 + $0x58] sm:$0xff]  ;;  %s177_s1 = sshll.u32 %s377_s0, 4  ;;  %s378_s24 = smov 64   ;;  %s178_s1 = int_to_ptr.vmem [resolvable:$true] %s177_s1 }
   0xe   :  { %241 = vmatpush.msra.mxu2 %v75_v0  ;;  %242 = vmatpush.msra.mxu3 %v75_v0  ;;  %v70_v5 = vld [vmem:[#allocation5 + $0x50] sm:$0xff]  ;;  %v69_v6 = vld [vmem:[#allocation5 + $0x48] sm:$0xff]  ;;  %v68_v7 = vld [vmem:[#allocation5 + $0x40] sm:$0xff]  ;;  %s379_s25 = smov 4  }
   0xf   :  { %77 = vmatpush.msra.mxu0 %v74_v1  ;;  %243 = vmatpush.msra.mxu1 %v74_v1  ;;  %v67_v8 = vld [vmem:[#allocation5 + $0x38] sm:$0xff]  ;;  %v66_v9 = vld [vmem:[#allocation5 + $0x30] sm:$0xff]  ;;  %v65_v10 = vld [vmem:[#allocation5 + $0x28] sm:$0xff] }
  0x10   :  { %244 = vmatpush.msra.mxu2 %v74_v1  ;;  %245 = vmatpush.msra.mxu3 %v74_v1  ;;  %v64_v11 = vld [vmem:[#allocation5 + $0x20] sm:$0xff]  ;;  %v63_v12 = vld [vmem:[#allocation5 + $0x18] sm:$0xff]  ;;  %v62_v13 = vld [vmem:[#allocation5 + $0x10] sm:$0xff] }
  0x11   :  { %78 = vmatpush.msra.mxu0 %v73_v2  ;;  %246 = vmatpush.msra.mxu1 %v73_v2  ;;  %v61_v14 = vld [vmem:[#allocation5 + $0x8] sm:$0xff]  ;;  %v60_v15 = vld [vmem:[#allocation5] sm:$0xff]  ;;  %v46_v24 = vld [vmem:[#allocation2 + $0x10] sm:$0xff] }
  0x12   :  { %247 = vmatpush.msra.mxu2 %v73_v2  ;;  %248 = vmatpush.msra.mxu3 %v73_v2  ;;  %v44_v16 = vld [vmem:[#allocation2] sm:$0xff]  ;;  %v45_v20 = vld [vmem:[#allocation2 + $0x8] sm:$0xff]  ;;  %v50_v25 = vld [vmem:[#allocation2 + $0x30] sm:$0xff] }
  0x13   :  { %79 = vmatpush.msra.mxu0 %v72_v3  ;;  %249 = vmatpush.msra.mxu1 %v72_v3  ;;  %v48_v17 = vld [vmem:[#allocation2 + $0x20] sm:$0xff]  ;;  %v49_v21 = vld [vmem:[#allocation2 + $0x28] sm:$0xff]  ;;  %v54_v26 = vld [vmem:[#allocation2 + $0x50] sm:$0xff] }
  0x14   :  { %250 = vmatpush.msra.mxu2 %v72_v3  ;;  %251 = vmatpush.msra.mxu3 %v72_v3  ;;  %v52_v18 = vld [vmem:[#allocation2 + $0x40] sm:$0xff]  ;;  %v53_v22 = vld [vmem:[#allocation2 + $0x48] sm:$0xff]  ;;  %v58_v27 = vld [vmem:[#allocation2 + $0x70] sm:$0xff] }
  0x15   :  { %80 = vmatpush.msra.mxu0 %v71_v4  ;;  %252 = vmatpush.msra.mxu1 %v71_v4  ;;  %v56_v19 = vld [vmem:[#allocation2 + $0x60] sm:$0xff]  ;;  %v57_v23 = vld [vmem:[#allocation2 + $0x68] sm:$0xff]  ;;  %v47_v28 = vld [vmem:[#allocation2 + $0x18] sm:$0xff] }
  0x16   :  { %253 = vmatpush.msra.mxu2 %v71_v4  ;;  %254 = vmatpush.msra.mxu3 %v71_v4  ;;  %v51_v29 = vld [vmem:[#allocation2 + $0x38] sm:$0xff] }
  0x17   :  { %81 = vmatpush.msra.mxu0 %v70_v5  ;;  %255 = vmatpush.msra.mxu1 %v70_v5  ;;  %v55_v30 = vld [vmem:[#allocation2 + $0x58] sm:$0xff] }
  0x18   :  { %256 = vmatpush.msra.mxu2 %v70_v5  ;;  %257 = vmatpush.msra.mxu3 %v70_v5  ;;  %v59_v31 = vld [vmem:[#allocation2 + $0x78] sm:$0xff] }
  0x19   :  { %82 = vmatpush.msra.mxu0 %v69_v6  ;;  %258 = vmatpush.msra.mxu1 %v69_v6 }
  0x1a   :  { %259 = vmatpush.msra.mxu2 %v69_v6  ;;  %260 = vmatpush.msra.mxu3 %v69_v6 }
  0x1b   :  { %83 = vmatpush.msra.mxu0 %v68_v7  ;;  %261 = vmatpush.msra.mxu1 %v68_v7 }
  0x1c   :  { %262 = vmatpush.msra.mxu2 %v68_v7  ;;  %263 = vmatpush.msra.mxu3 %v68_v7 }
  0x1d   :  { %84 = vmatpush.msra.mxu0 %v67_v8  ;;  %264 = vmatpush.msra.mxu1 %v67_v8 }
  0x1e   :  { %265 = vmatpush.msra.mxu2 %v67_v8  ;;  %266 = vmatpush.msra.mxu3 %v67_v8 }
  0x1f   :  { %85 = vmatpush.msra.mxu0 %v66_v9  ;;  %267 = vmatpush.msra.mxu1 %v66_v9 }
  0x20   :  { %268 = vmatpush.msra.mxu2 %v66_v9  ;;  %269 = vmatpush.msra.mxu3 %v66_v9 }
  0x21   :  { %86 = vmatpush.msra.mxu0 %v65_v10  ;;  %270 = vmatpush.msra.mxu1 %v65_v10 }
  0x22   :  { %271 = vmatpush.msra.mxu2 %v65_v10  ;;  %272 = vmatpush.msra.mxu3 %v65_v10 }
  0x23   :  { %87 = vmatpush.msra.mxu0 %v64_v11  ;;  %273 = vmatpush.msra.mxu1 %v64_v11 }
  0x24   :  { %274 = vmatpush.msra.mxu2 %v64_v11  ;;  %275 = vmatpush.msra.mxu3 %v64_v11 }
  0x25   :  { %88 = vmatpush.msra.mxu0 %v63_v12  ;;  %276 = vmatpush.msra.mxu1 %v63_v12 }
  0x26   :  { %277 = vmatpush.msra.mxu2 %v63_v12  ;;  %278 = vmatpush.msra.mxu3 %v63_v12 }
  0x27   :  { %89 = vmatpush.msra.mxu0 %v62_v13  ;;  %279 = vmatpush.msra.mxu1 %v62_v13 }
  0x28   :  { %280 = vmatpush.msra.mxu2 %v62_v13  ;;  %281 = vmatpush.msra.mxu3 %v62_v13 }
  0x29   :  { %90 = vmatpush.msra.mxu0 %v61_v14  ;;  %282 = vmatpush.msra.mxu1 %v61_v14 }
  0x2a   :  { %283 = vmatpush.msra.mxu2 %v61_v14  ;;  %284 = vmatpush.msra.mxu3 %v61_v14 }
  0x2b   :  { %91 = vmatpush.msra.mxu0 %v60_v15  ;;  %285 = vmatpush.msra.mxu1 %v60_v15 }
  0x2c   :  { %286 = vmatpush.msra.mxu2 %v60_v15  ;;  %287 = vmatpush.msra.mxu3 %v60_v15 }
  0x2d   :  { %92 = vmatmul.f32.vlgmr.msra.gmra.mxu0 %v44_v16  ;;  %104 = vmatmul.f32.vlgmr.msra.gmra.mxu1 %v48_v17 }
  0x2e   :  { %116 = vmatmul.f32.vlgmr.msra.gmra.mxu2 %v52_v18  ;;  %128 = vmatmul.f32.vlgmr.msra.gmra.mxu3 %v56_v19 }
  0x35   :  { %95 = vmatmul.f32.gmra.mxu0 %v45_v20  ;;  %107 = vmatmul.f32.gmra.mxu1 %v49_v21 }
  0x36   :  { %119 = vmatmul.f32.gmra.mxu2 %v53_v22  ;;  %131 = vmatmul.f32.gmra.mxu3 %v57_v23 }
  0x3d   :  { %98 = vmatmul.f32.gmra.mxu0 %v46_v24  ;;  %110 = vmatmul.f32.gmra.mxu1 %v50_v25 }
  0x3e   :  { %122 = vmatmul.f32.gmra.mxu2 %v54_v26  ;;  %134 = vmatmul.f32.gmra.mxu3 %v58_v27 }
  0x45   :  { %101 = vmatmul.f32.gmra.mxu0 %v47_v28  ;;  %113 = vmatmul.f32.gmra.mxu1 %v51_v29 }
  0x46   :  { %125 = vmatmul.f32.gmra.mxu2 %v55_v30  ;;  %137 = vmatmul.f32.gmra.mxu3 %v59_v31 }
  0xaa   :  { %v93_v32 = vpop.f32.mrf.mxu0  ;;  %v105_v33 = vpop.f32.mrf.mxu1 }
  0xb1   :  { %v117_v34 = vpop.f32.mrf.mxu2  ;;  %v129_v35 = vpop.f32.mrf.mxu3 }
  0xb2   :  { %v96_v36 = vpop.f32.mrf.mxu0  ;;  %v108_v37 = vpop.f32.mrf.mxu1 }
  0xb3   :  { %v196_v38 = vpack.c.bf16 %v96_v36, %v93_v32  ;;  %v206_v39 = vpack.c.bf16 %v108_v37, %v105_v33 }
  0xb5   :  { %197 = vst [vmem:[#allocation7] sm:$0xff] %v196_v38  }
  0xb6   :  { %234 = vst [vmem:[#allocation7 + $0x10] sm:$0xff] %v206_v39  }
  0xb9   :  { %v120_v40 = vpop.f32.mrf.mxu2  ;;  %v132_v41 = vpop.f32.mrf.mxu3 }
  0xba   :  { %v216_v42 = vpack.c.bf16 %v120_v40, %v117_v34  ;;  %v226_v43 = vpack.c.bf16 %v132_v41, %v129_v35  ;;  %v99_v44 = vpop.f32.mrf.mxu0  ;;  %v111_v45 = vpop.f32.mrf.mxu1 }
  0xbc   :  { %236 = vst [vmem:[#allocation7 + $0x20] sm:$0xff] %v216_v42  }
  0xbd   :  { %238 = vst [vmem:[#allocation7 + $0x30] sm:$0xff] %v226_v43  }
  0xc1   :  { %v123_v46 = vpop.f32.mrf.mxu2  ;;  %v135_v47 = vpop.f32.mrf.mxu3 }
  0xc2   :  { %v102_v48 = vpop.f32.mrf.mxu0  ;;  %v114_v49 = vpop.f32.mrf.mxu1 }
  0xc3   :  { %v201_v50 = vpack.c.bf16 %v102_v48, %v99_v44  ;;  %v211_v51 = vpack.c.bf16 %v114_v49, %v111_v45 }
  0xc5   :  { %233 = vst [vmem:[#allocation7 + $0x8] sm:$0xff] %v201_v50  }
  0xc6   :  { %235 = vst [vmem:[#allocation7 + $0x18] sm:$0xff] %v211_v51  }
  0xc9   :  { %v126_v52 = vpop.f32.mrf.mxu2  ;;  %v138_v53 = vpop.f32.mrf.mxu3 }
  0xca   :  { %v221_v54 = vpack.c.bf16 %v126_v52, %v123_v46  ;;  %v231_v55 = vpack.c.bf16 %v138_v53, %v135_v47 }
  0xcc   :  { %237 = vst [vmem:[#allocation7 + $0x28] sm:$0xff] %v221_v54  }
  0xcd   :  { %239 = vst [vmem:[#allocation7 + $0x38] sm:$0xff] %v231_v55  }
  0xce   :  { %185 = dma.vmem_to_hbm [thread:$0]  %s178_s1, 1024, %s180_s23, [#allocation4], %s378_s24, %s378_s24, %s379_s25  }
  0xcf   :  { %371 = dma.done.wait [#allocation4], 1024  }
  0xd0   :  { %372 = vsyncadd [#allocation4], 4294966272 }
  0xd1   :  { %190 = vsyncpa [#allocation3], 1 }
  0xd2   :  { %191 = vsyncpa [#allocation6], 1 }
  0xd3   :  { %192 = vsyncpa [#allocation4], 1 }

</bundles_post_ra>
